<compile_context>
chip_gen: v6e
topology: v6e:2x2x1
jax: 0.10.0
libtpu: 0.0.40
codegen_flags: <defaults>
</compile_context>

<pallas_src>
import functools

import jax
import jax.numpy as jnp
from jax.experimental import pallas as pl
from jax.experimental.pallas import tpu as pltpu


def _round_up(n, m):
    return ((n + m - 1) // m) * m


def mlp_kernel(x_ref, w1_ref, w23_ref, b_ref, o_ref, *, p):
    # x tile arrives in its native dtype (f32); cast to bf16 on the VPU so the
    # MXU runs its native bf16 path while all accumulation stays f32.
    x = x_ref[...].astype(jnp.bfloat16)

    # fc1 + relu : (bt, D) @ (D, P) -> (bt, P) f32
    h1 = jnp.dot(x, w1_ref[...], preferred_element_type=jnp.float32)
    h1 = jnp.maximum(h1 + b_ref[0:1, :], 0.0)

    # fc2 + relu : (bt, P) @ (P, P) -> (bt, P) f32   (w2 slab = rows [0:P))
    h2 = jnp.dot(h1.astype(jnp.bfloat16), w23_ref[0:p, :],
                 preferred_element_type=jnp.float32)
    h2 = jnp.maximum(h2 + b_ref[1:2, :], 0.0)

    # fc3 (no activation) : (bt, P) @ (P, P) -> (bt, P)   (w3 slab = rows [P:2P))
    o = jnp.dot(h2.astype(jnp.bfloat16), w23_ref[p:2 * p, :],
                preferred_element_type=jnp.float32)

    # Lane-dense (bt, P) store, narrowed to bf16 at the very end.
    o_ref[...] = (o + b_ref[2:3, :]).astype(o_ref.dtype)


def prepack_params(params):
    """One-time prep: transpose to (in, out), zero-pad to 128 lanes, cast weights
    to bf16, pack w2+w3 into one slab and all biases into one block.

    params: PyTorch-layout weights  w1 (32, D), b1 (32,), w2 (32, 32), b2 (32,),
            w3 (C, 32), b3 (C,).
    """
    w1, w2, w3 = params["w1"], params["w2"], params["w3"]
    H, D = w1.shape                     # hidden (32), input_size
    C = w3.shape[0]                     # num_classes
    LANE = 128
    P = _round_up(max(H, C), LANE)      # padded hidden / output width (128)

    w1p = jnp.zeros((D, P), jnp.bfloat16).at[:, :H].set(w1.T.astype(jnp.bfloat16))

    # w2^T in rows [0, P), w3^T in rows [P, 2P): one resident (2P, P) block.
    w23p = (jnp.zeros((2 * P, P), jnp.bfloat16)
            .at[:H, :H].set(w2.T.astype(jnp.bfloat16))
            .at[P:P + H, :C].set(w3.T.astype(jnp.bfloat16)))

    b_all = (jnp.zeros((3, P), jnp.float32)
             .at[0, :H].set(params["b1"].astype(jnp.float32))
             .at[1, :H].set(params["b2"].astype(jnp.float32))
             .at[2, :C].set(params["b3"].astype(jnp.float32)))

    return {"w1p": w1p, "w23p": w23p, "b_all": b_all,
            "D": int(D), "H": int(H), "C": int(C), "P": int(P)}


def _choose_batch_tile(B, batch_tile):
    SUB = 16  # bf16 sublane packing for the output tile
    batch_tile = max(SUB, _round_up(int(batch_tile), SUB))
    if B <= batch_tile:
        # Single block equal to the full batch dim (always a legal block shape,
        # no padding / ragged handling needed).
        return B
    return batch_tile


def net_forward(x, packed, *, batch_tile=4096):
    """3-layer MLP forward in one Pallas kernel.

    x:      (B, input_size) float32 (consumed directly; no wrapper cast/pad pass)
    packed: output of prepack_params()
    Returns (B, num_classes) bfloat16 logits.
    """
    B, D = x.shape
    assert D == packed["D"], f"input_size mismatch: {D} vs {packed['D']}"
    P, C = packed["P"], packed["C"]

    bt = _choose_batch_tile(B, batch_tile)
    grid = (pl.cdiv(B, bt),)
    # Ragged last tile (B % bt != 0) is clamped by the Pallas pipeline: OOB input
    # rows hold unspecified data but rows are independent and OOB output rows are
    # never written back, so the [:B, :C] slice below is exact.

    rows_exec = grid[0] * bt
    flops = 2 * rows_exec * (D * P + 2 * P * P)       # padded work actually run
    bytes_accessed = (B * D * x.dtype.itemsize
                      + packed["w1p"].size * 2
                      + packed["w23p"].size * 2
                      + packed["b_all"].size * 4
                      + B * P * 2)                    # bf16 output stream
    cost = pl.CostEstimate(flops=int(flops), transcendentals=0,
                           bytes_accessed=int(bytes_accessed))

    out_padded = pl.pallas_call(
        functools.partial(mlp_kernel, p=P),
        out_shape=jax.ShapeDtypeStruct((B, P), jnp.bfloat16),
        grid_spec=pltpu.PrefetchScalarGridSpec(
            num_scalar_prefetch=0,
            grid=grid,
            in_specs=[
                pl.BlockSpec((bt, D), lambda i: (i, 0)),       # x tile (pipelined)
                pl.BlockSpec((D, P), lambda i: (0, 0)),        # w1^T (resident)
                pl.BlockSpec((2 * P, P), lambda i: (0, 0)),    # w2^T|w3^T slab (resident)
                pl.BlockSpec((3, P), lambda i: (0, 0)),        # packed biases (resident)
            ],
            out_specs=pl.BlockSpec((bt, P), lambda i: (i, 0)),  # lane-dense bf16 store
        ),
        compiler_params=pltpu.CompilerParams(
            dimension_semantics=("parallel",),
            vmem_limit_bytes=32 * 1024 * 1024,
        ),
        cost_estimate=cost,
    )(x, packed["w1p"], packed["w23p"], packed["b_all"])

    # Strip lane padding of the class dim in XLA.
    return out_padded[:B, :C]


def init_params(key, input_size, num_classes, hidden=32):
    """Deterministic synthetic init matching PyTorch nn.Linear shapes
    (weight: (out_features, in_features), bias: (out_features,))."""
    k = jax.random.split(key, 6)

    def lin(kw, kb, fan_in, fan_out):
        bound = 1.0 / jnp.sqrt(fan_in)
        w = jax.random.uniform(kw, (fan_out, fan_in), jnp.float32, -bound, bound)
        b = jax.random.uniform(kb, (fan_out,), jnp.float32, -bound, bound)
        return w, b

    w1, b1 = lin(k[0], k[1], input_size, hidden)
    w2, b2 = lin(k[2], k[3], hidden, hidden)
    w3, b3 = lin(k[4], k[5], hidden, num_classes)
    return {"w1": w1, "b1": b1, "w2": w2, "b2": b2, "w3": w3, "b3": b3}


def net_forward_ref(x, p):
    h = jnp.maximum(x @ p["w1"].T + p["b1"], 0.0)
    h = jnp.maximum(h @ p["w2"].T + p["b2"], 0.0)
    return h @ p["w3"].T + p["b3"]


if __name__ == "__main__":
    key = jax.random.PRNGKey(0)
    k_x, k_p = jax.random.split(key)

    batch = 8
    input_size = 64
    num_classes = 6

    params = init_params(k_p, input_size, num_classes)
    packed = prepack_params(params)   # one-time weight prepack

    # Small single-block run.
    x = jax.random.normal(k_x, (batch, input_size), dtype=jnp.float32)
    out = jax.block_until_ready(net_forward(x, packed))
    ref = net_forward_ref(x, params)
    assert out.shape == (batch, num_classes)
    err = float(jnp.max(jnp.abs(out.astype(jnp.float32) - ref)))
    # bf16 inputs/weights/output -> relaxed tolerance vs the f32 reference.
    assert jnp.allclose(out.astype(jnp.float32), ref, atol=5e-2, rtol=5e-2), (
        f"mismatch vs reference (max abs err {err})")

    # Multi-step pipelined grid (4 exact tiles of 16 rows) to exercise batch tiling.
    x2 = jax.random.normal(k_x, (64, input_size), dtype=jnp.float32)
    out2 = jax.block_until_ready(net_forward(x2, packed, batch_tile=16))
    ref2 = net_forward_ref(x2, params)
    assert out2.shape == (64, num_classes)
    assert jnp.allclose(out2.astype(jnp.float32), ref2, atol=5e-2, rtol=5e-2)

    print("KERNEL_OK")
</pallas_src>

<mosaic_0001>
module attributes {stable_mosaic.version = 11 : i64} {
  func.func @mlp_kernel(%arg0: i32, %arg1: memref<8x64xf32, #tpu.memory_space<vmem>>, %arg2: memref<64x128xbf16, #tpu.memory_space<vmem>>, %arg3: memref<256x128xbf16, #tpu.memory_space<vmem>>, %arg4: memref<3x128xf32, #tpu.memory_space<vmem>>, %arg5: memref<8x128xbf16, #tpu.memory_space<vmem>>) attributes {dimension_semantics = [#tpu.dimension_semantics<parallel>], iteration_bounds = array<i64: 1>, scalar_prefetch = 0 : i64, scratch_operands = 0 : i64, tpu.core_type = #tpu.core_type<tc>, window_params = [{transform_indices = @transform_0, window_bounds = array<i64: 8, 64>}, {pipeline_mode = #tpu.pipeline_mode<synchronous>, transform_indices = @transform_1, window_bounds = array<i64: 64, 128>}, {pipeline_mode = #tpu.pipeline_mode<synchronous>, transform_indices = @transform_2, window_bounds = array<i64: 256, 128>}, {pipeline_mode = #tpu.pipeline_mode<synchronous>, transform_indices = @transform_3, window_bounds = array<i64: 3, 128>}, {transform_indices = @transform_4, window_bounds = array<i64: 8, 128>}]} {
    %c0 = arith.constant 0 : index
    %c0_0 = arith.constant 0 : index
    %0 = vector.load %arg1[%c0, %c0_0] : memref<8x64xf32, #tpu.memory_space<vmem>>, vector<8x64xf32>
    %1 = arith.truncf %0 : vector<8x64xf32> to vector<8x64xbf16>
    %c0_1 = arith.constant 0 : index
    %c0_2 = arith.constant 0 : index
    %2 = vector.load %arg2[%c0_1, %c0_2] : memref<64x128xbf16, #tpu.memory_space<vmem>>, vector<64x128xbf16>
    %cst = arith.constant dense<0.000000e+00> : vector<8x128xf32>
    %3 = tpu.matmul %1, %2, %cst {dimension_numbers = #tpu.dot_dimension_numbers<[1], [0], [0], [1], [0, 0, 1, 1], [], []>} : vector<8x64xbf16>, vector<64x128xbf16>, vector<8x128xf32> -> vector<8x128xf32>
    %c0_3 = arith.constant 0 : index
    %c0_4 = arith.constant 0 : index
    %4 = vector.load %arg4[%c0_3, %c0_4] : memref<3x128xf32, #tpu.memory_space<vmem>>, vector<1x128xf32>
    %5 = vector.broadcast %4 : vector<1x128xf32> to vector<8x128xf32>
    %6 = arith.addf %3, %5 : vector<8x128xf32>
    %cst_5 = arith.constant 0.000000e+00 : f32
    %7 = vector.broadcast %cst_5 : f32 to vector<8x128xf32>
    %8 = arith.maximumf %6, %7 : vector<8x128xf32>
    %9 = arith.truncf %8 : vector<8x128xf32> to vector<8x128xbf16>
    %c0_6 = arith.constant 0 : index
    %c0_7 = arith.constant 0 : index
    %10 = vector.load %arg3[%c0_6, %c0_7] : memref<256x128xbf16, #tpu.memory_space<vmem>>, vector<128x128xbf16>
    %cst_8 = arith.constant dense<0.000000e+00> : vector<8x128xf32>
    %11 = tpu.matmul %9, %10, %cst_8 {dimension_numbers = #tpu.dot_dimension_numbers<[1], [0], [0], [1], [0, 0, 1, 1], [], []>} : vector<8x128xbf16>, vector<128x128xbf16>, vector<8x128xf32> -> vector<8x128xf32>
    %c1 = arith.constant 1 : index
    %c0_9 = arith.constant 0 : index
    %12 = vector.load %arg4[%c1, %c0_9] : memref<3x128xf32, #tpu.memory_space<vmem>>, vector<1x128xf32>
    %13 = vector.broadcast %12 : vector<1x128xf32> to vector<8x128xf32>
    %14 = arith.addf %11, %13 : vector<8x128xf32>
    %cst_10 = arith.constant 0.000000e+00 : f32
    %15 = vector.broadcast %cst_10 : f32 to vector<8x128xf32>
    %16 = arith.maximumf %14, %15 : vector<8x128xf32>
    %17 = arith.truncf %16 : vector<8x128xf32> to vector<8x128xbf16>
    %c128 = arith.constant 128 : index
    %c0_11 = arith.constant 0 : index
    %18 = vector.load %arg3[%c128, %c0_11] : memref<256x128xbf16, #tpu.memory_space<vmem>>, vector<128x128xbf16>
    %cst_12 = arith.constant dense<0.000000e+00> : vector<8x128xf32>
    %19 = tpu.matmul %17, %18, %cst_12 {dimension_numbers = #tpu.dot_dimension_numbers<[1], [0], [0], [1], [0, 0, 1, 1], [], []>} : vector<8x128xbf16>, vector<128x128xbf16>, vector<8x128xf32> -> vector<8x128xf32>
    %c2 = arith.constant 2 : index
    %c0_13 = arith.constant 0 : index
    %20 = vector.load %arg4[%c2, %c0_13] : memref<3x128xf32, #tpu.memory_space<vmem>>, vector<1x128xf32>
    %21 = vector.broadcast %20 : vector<1x128xf32> to vector<8x128xf32>
    %22 = arith.addf %19, %21 : vector<8x128xf32>
    %23 = arith.truncf %22 : vector<8x128xf32> to vector<8x128xbf16>
    %c0_14 = arith.constant 0 : index
    %c0_15 = arith.constant 0 : index
    %24 = vector.load %arg5[%c0_14, %c0_15] : memref<8x128xbf16, #tpu.memory_space<vmem>>, vector<8x128xbf16>
    tpu.vector_store %arg5[%c0_14, %c0_15], %23 {strides = array<i32>} : memref<8x128xbf16, #tpu.memory_space<vmem>>, vector<8x128xbf16>,
    return
  }
  func.func @transform_0(%arg0: i32) -> (i32, i32) {
    %c0_i32 = arith.constant 0 : i32
    %c0_i32_0 = arith.constant 0 : i32
    return %arg0, %c0_i32 : i32, i32
  }
  func.func @transform_1(%arg0: i32) -> (i32, i32) {
    %c0_i32 = arith.constant 0 : i32
    %c0_i32_0 = arith.constant 0 : i32
    %c0_i32_1 = arith.constant 0 : i32
    return %c0_i32, %c0_i32_0 : i32, i32
  }
  func.func @transform_2(%arg0: i32) -> (i32, i32) {
    %c0_i32 = arith.constant 0 : i32
    %c0_i32_0 = arith.constant 0 : i32
    %c0_i32_1 = arith.constant 0 : i32
    return %c0_i32, %c0_i32_0 : i32, i32
  }
  func.func @transform_3(%arg0: i32) -> (i32, i32) {
    %c0_i32 = arith.constant 0 : i32
    %c0_i32_0 = arith.constant 0 : i32
    %c0_i32_1 = arith.constant 0 : i32
    return %c0_i32, %c0_i32_0 : i32, i32
  }
  func.func @transform_4(%arg0: i32) -> (i32, i32) {
    %c0_i32 = arith.constant 0 : i32
    %c0_i32_0 = arith.constant 0 : i32
    return %arg0, %c0_i32 : i32, i32
  }
}

</mosaic_0001>

<bundles_post_ra>
// kernel: tpu_custom_call.1
= control target key start
LH: loop header
LB: loop body
LE: loop exit
PB: predicated region body
PF: predicated region fallthrough
CT: control target
= control target key end

     0   :  { %9 = vsyncpa [#allocation3], 0  ;;  %s674_s0 = inlined_call_operand.hbm [shape: f32[8,64], index: 0, kind: input, shape index: {}]   ;;  %s675_s1 = inlined_call_operand.hbm [shape: bf16[64,128], index: 1, kind: input, shape index: {}]   ;;  %s676_s2 = inlined_call_operand.hbm [shape: bf16[256,128], index: 2, kind: input, shape index: {}]   ;;  %s677_s3 = inlined_call_operand.vmem [shape: f32[3,128], index: 3, kind: input, shape index: {}]   ;;  %s678_s4 = inlined_call_operand.hbm [shape: bf16[8,128], index: 4, kind: output, shape index: {}]  }
   0x1   :  { %10 = vsyncpa [#allocation6], 0 }
   0x2   :  { %11 = vsyncpa [#allocation4], 0  ;;  %s594_s15 = smov [#allocation5]  }
   0x3   :  { %s27_s16 = sshll.u32 %s594_s15, 4  ;;  %s28_s16 = int_to_ptr.vmem [resolvable:$true] %s27_s16 }
   0x4   :  { %s516_s17 = scalar_lea.vmem %s28_s16, 512  ;;  %p521_p1 = scmp.lt.s32.totalorder %s28_s16, %s28_s16 }
   0x5   :  { %p517_p0 = scmp.ne.s32.totalorder %s28_s16, %s516_s17  ;;  %p522_p2 = scmp.lt.s32.totalorder %s516_s17, %s516_s17 }
   0x7   :  { %p523_p3 = por %p522_p2, %p521_p1 }
   0x9   :  { %p524_p4 = pnand %p523_p3, %p517_p0 }
   0xb   :  { %527 = shalt.err (!%p524_p4)
}
   0xc   :  { %s595_s18 = smov 64   ;;  %s596_s19 = smov 4  }
   0xd   :  { %33 = dma.hbm_to_vmem [thread:$0]  %s675_s1, 512, %s28_s16, [#allocation6], %s595_s18, %s595_s18, %s596_s19  }
   0xe   :  { %s597_s22 = smov [#allocation2]   ;;  %s598_s24 = smov [#allocation7]  }
   0xf   :  { %s18_s23 = sshll.u32 %s597_s22, 4  ;;  %s39_s25 = sshll.u32 %s598_s24, 4  ;;  %s19_s23 = int_to_ptr.vmem [resolvable:$true] %s18_s23  ;;  %s40_s25 = int_to_ptr.vmem [resolvable:$true] %s39_s25 }
  0x10   :  { %s536_s26 = scalar_lea.vmem %s19_s23, 128  ;;  %p541_p6 = scmp.lt.s32.totalorder %s19_s23, %s19_s23 }
  0x11   :  { %p537_p5 = scmp.ne.s32.totalorder %s19_s23, %s536_s26  ;;  %p542_p7 = scmp.lt.s32.totalorder %s536_s26, %s536_s26 }
  0x13   :  { %p543_p8 = por %p542_p7, %p541_p6 }
  0x15   :  { %p544_p9 = pnand %p543_p8, %p537_p5 }
  0x17   :  { %547 = shalt.err (!%p544_p9)
}
  0x18   :  { %21 = dma.hbm_to_vmem [thread:$0]  %s674_s0, 128, %s19_s23, [#allocation3]  }
  0x19   :  { %s556_s29 = scalar_lea.vmem %s40_s25, 2048  ;;  %p561_p11 = scmp.lt.s32.totalorder %s40_s25, %s40_s25 }
  0x1a   :  { %p557_p10 = scmp.ne.s32.totalorder %s40_s25, %s556_s29  ;;  %p562_p12 = scmp.lt.s32.totalorder %s556_s29, %s556_s29 }
  0x1c   :  { %p563_p13 = por %p562_p12, %p561_p11 }
  0x1e   :  { %p564_p0 = pnand %p563_p13, %p557_p10 }
  0x20   :  { %567 = shalt.err (!%p564_p0)
}
  0x21   :  { %45 = dma.hbm_to_vmem [thread:$0]  %s676_s2, 2048, %s40_s25, [#allocation6], %s595_s18, %s595_s18, %s596_s19  }
  0x22   :  { %588 = dma.done.wait [#allocation3], 128  }
  0x23   :  { %589 = vsyncadd [#allocation3], 4294967168 }
  0x24   :  { %590 = dma.done.wait [#allocation6], 2560  }
  0x25   :  { %591 = vsyncadd [#allocation6], 4294964736  ;;  %v599_v0 = vmov 0.0   ;;  %vm600_vm0 = vmmov 0   ;;  %v488_v1 = vld [vmem:[#allocation5 + $0x18] sm:$0xff]   ;;  %v489_v2 = vld [vmem:[#allocation5 + $0x10] sm:$0xff]  }
  0x26   :  { %428 = vmatprep.subr.bf16.mxu0 %v599_v0  ;;  %436 = vmatprep.mubr.msk.bf16.mxu0 %vm600_vm0, %v599_v0  ;;  %v492_v3 = vld [vmem:[#allocation7 + $0x38] sm:$0xff]   ;;  %v490_v4 = vld [vmem:[#allocation5 + $0x8] sm:$0xff]   ;;  %v493_v5 = vld [vmem:[#allocation7 + $0x30] sm:$0xff]   ;;  %vm97_vm1 = vcmask 523264   ;;  %s601_s9 = smov [#allocation8]  }
  0x27   :  { %440 = vmatprep.subr.bf16.mxu1 %v599_v0  ;;  %456 = vmatprep.mubr.msk.bf16.mxu1 %vm600_vm0, %v599_v0  ;;  %v491_v6 = vld [vmem:[#allocation5] sm:$0xff]   ;;  %v58_v7 = vld [vmem:[#allocation2] sm:$0xff]  ;;  %v494_v8 = vld [vmem:[#allocation7 + $0x28] sm:$0xff]   ;;  %s371_s10 = sshll.u32 %s601_s9, 4  ;;  %s372_s10 = int_to_ptr.vmem [resolvable:$true] %s371_s10 }
  0x28   :  { %429 = vmatpush3.bf16.msra.mxu0 %v488_v1  ;;  %441 = vmatpush3.bf16.msra.mxu1 %v492_v3  ;;  %v59_v9 = vpack.c.bf16 %v58_v7, %v58_v7  ;;  %v495_v10 = vld [vmem:[#allocation7 + $0x20] sm:$0xff]   ;;  %v496_v11 = vld [vmem:[#allocation7 + $0x18] sm:$0xff]   ;;  %v497_v12 = vld [vmem:[#allocation7 + $0x10] sm:$0xff]   ;;  %s568_s11 = scalar_lea.vmem %s372_s10, 64  ;;  %p573_p2 = scmp.lt.s32.totalorder %s372_s10, %s372_s10 }
  0x29   :  { %430 = vmatprep.subr.bf16.mxu0 %v599_v0  ;;  %442 = vmatprep.subr.bf16.mxu1 %v599_v0  ;;  %v498_v13 = vld [vmem:[#allocation7 + $0x8] sm:$0xff]   ;;  %v499_v14 = vld [vmem:[#allocation7] sm:$0xff]   ;;  %v500_v15 = vld [vmem:[#allocation7 + $0x78] sm:$0xff]   ;;  %p569_p1 = scmp.ne.s32.totalorder %s372_s10, %s568_s11  ;;  %p574_p3 = scmp.lt.s32.totalorder %s568_s11, %s568_s11 }
  0x2a   :  { %v501_v16 = vld [vmem:[#allocation7 + $0x70] sm:$0xff]   ;;  %v502_v17 = vld [vmem:[#allocation7 + $0x68] sm:$0xff]   ;;  %v503_v18 = vld [vmem:[#allocation7 + $0x60] sm:$0xff]  }
  0x2b   :  { %v504_v19 = vld [vmem:[#allocation7 + $0x58] sm:$0xff]   ;;  %v505_v20 = vld [vmem:[#allocation7 + $0x50] sm:$0xff]   ;;  %v506_v29 = vld [vmem:[#allocation7 + $0x48] sm:$0xff]   ;;  %p575_p4 = por %p574_p3, %p573_p2 }
  0x2c   :  { %431 = vmatpush3.bf16.msra.mxu0 %v489_v2  ;;  %443 = vmatpush3.bf16.msra.mxu1 %v493_v5  ;;  %v381_v21 = vld [vmem:[%s677_s3] ss:$0 sm:$0xff]  ;;  %v507_v30 = vld [vmem:[#allocation7 + $0x40] sm:$0xff]   ;;  %v387_v31 = vld [vmem:[%s677_s3 + $0x1] ss:$0 sm:$0xff] }
  0x2d   :  { %432 = vmatprep.subr.bf16.mxu0 %v599_v0  ;;  %444 = vmatprep.subr.bf16.mxu1 %v599_v0  ;;  %v396_v39 = vld [vmem:[%s677_s3 + $0x2] ss:$0 sm:$0xff]  ;;  %p576_p5 = pnand %p575_p4, %p569_p1 }
  0x30   :  { %433 = vmatpush3.bf16.msra.mxu0 %v490_v4  ;;  %445 = vmatpush3.bf16.msra.mxu1 %v494_v8 }
  0x31   :  { %434 = vmatprep.subr.bf16.mxu0 %v599_v0  ;;  %446 = vmatprep.subr.bf16.mxu1 %v599_v0 }
  0x34   :  { %435 = vmatpush3.bf16.msra.mxu0 %v491_v6  ;;  %447 = vmatpush3.bf16.msra.mxu1 %v495_v10 }
  0x35   :  { %460 = vmatprep.subr.bf16.mxu0 %v599_v0  ;;  %448 = vmatprep.subr.bf16.mxu1 %v599_v0 }
  0x37   :  { %437 = vmatmul.mubr.msk.bf16.vlgmr.msra.gmra.mxu0 %vm97_vm1, %v59_v9 }
  0x38   :  { %476 = vmatprep.mubr.msk.bf16.mxu0 %vm600_vm0, %v599_v0  ;;  %449 = vmatpush3.bf16.msra.mxu1 %v496_v11 }
  0x39   :  { %450 = vmatprep.subr.bf16.mxu1 %v599_v0  ;;  %461 = vmatpush3.bf16.msra.mxu0 %v500_v15 }
  0x3a   :  { %462 = vmatprep.subr.bf16.mxu0 %v599_v0 }
  0x3c   :  { %451 = vmatpush3.bf16.msra.mxu1 %v497_v12 }
  0x3d   :  { %452 = vmatprep.subr.bf16.mxu1 %v599_v0  ;;  %463 = vmatpush3.bf16.msra.mxu0 %v501_v16 }
  0x3e   :  { %464 = vmatprep.subr.bf16.mxu0 %v599_v0 }
  0x40   :  { %453 = vmatpush3.bf16.msra.mxu1 %v498_v13 }
  0x41   :  { %454 = vmatprep.subr.bf16.mxu1 %v599_v0  ;;  %465 = vmatpush3.bf16.msra.mxu0 %v502_v17 }
  0x42   :  { %466 = vmatprep.subr.bf16.mxu0 %v599_v0 }
  0x44   :  { %455 = vmatpush3.bf16.msra.mxu1 %v499_v14 }
  0x45   :  { %467 = vmatpush3.bf16.msra.mxu0 %v503_v18 }
  0x46   :  { %468 = vmatprep.subr.bf16.mxu0 %v599_v0 }
  0x49   :  { %469 = vmatpush3.bf16.msra.mxu0 %v504_v19 }
  0x4a   :  { %470 = vmatprep.subr.bf16.mxu0 %v599_v0 }
  0x4d   :  { %471 = vmatpush3.bf16.msra.mxu0 %v505_v20 }
  0x4e   :  { %472 = vmatprep.subr.bf16.mxu0 %v599_v0 }
  0x51   :  { %473 = vmatpush3.bf16.msra.mxu0 %v506_v29 }
  0x52   :  { %474 = vmatprep.subr.bf16.mxu0 %v599_v0 }
  0x55   :  { %475 = vmatpush3.bf16.msra.mxu0 %v507_v30 }
  0xf7   :  { %v135_v22 = vpop.f32.mrf.mxu0 }
  0xf8   :  { %v136_v23 = vadd.f32 %v381_v21, %v135_v22 }
  0xf9   :  { %v438_v24 = vpop.f32.mrf.mxu0 }
  0xfa   :  { %v141_v25 = vmax.f32 %v136_v23, 0.0 }
  0xfb   :  { %v138_v26 = vpop.f32.mrf.mxu0 }
  0xfc   :  { %v142_v27 = vpack.c.bf16 %v141_v25, %v141_v25 }
  0xfd   :  { %v439_v28 = vpop.f32.mrf.mxu0 }
  0xfe   :  { %457 = vmatmul.mubr.bf16.vlgmr.msra.gmra.mxu1 %v142_v27 }
 0x1be   :  { %v246_v32 = vpop.f32.mrf.mxu1 }
 0x1bf   :  { %v247_v33 = vadd.f32 %v387_v31, %v246_v32 }
 0x1c0   :  { %v458_v34 = vpop.f32.mrf.mxu1 }
 0x1c1   :  { %v252_v35 = vmax.f32 %v247_v33, 0.0 }
 0x1c2   :  { %v249_v36 = vpop.f32.mrf.mxu1 }
 0x1c3   :  { %v253_v37 = vpack.c.bf16 %v252_v35, %v252_v35 }
 0x1c4   :  { %v459_v38 = vpop.f32.mrf.mxu1 }
 0x1c5   :  { %477 = vmatmul.mubr.bf16.vlgmr.msra.gmra.mxu0 %v253_v37 }
 0x285   :  { %v357_v40 = vpop.f32.mrf.mxu0 }
 0x286   :  { %v358_v41 = vadd.f32 %v396_v39, %v357_v40 }
 0x287   :  { %v478_v42 = vpop.f32.mrf.mxu0 }
 0x288   :  { %v363_v43 = vpack.c.bf16 %v358_v41, %v358_v41 }
 0x289   :  { %v360_v44 = vpop.f32.mrf.mxu0 }
 0x28a   :  { %364 = vst [vmem:[#allocation8] sm:$0xf] %v363_v43 }
 0x28b   :  { %v479_v45 = vpop.f32.mrf.mxu0 }
 0x28c   :  { %579 = shalt.err (!%p576_p5)
}
 0x28d   :  { %374 = dma.vmem_to_hbm [thread:$0]  %s372_s10, 64, %s678_s4, [#allocation4]  }
 0x28e   :  { %592 = dma.done.wait [#allocation4], 64  }
 0x28f   :  { %593 = vsyncadd [#allocation4], 4294967232 }
 0x290   :  { %378 = vsyncpa [#allocation3], 1 }
 0x291   :  { %379 = vsyncpa [#allocation6], 1 }
 0x292   :  { %380 = vsyncpa [#allocation4], 1 }

</bundles_post_ra>
